<compile_context>
chip_gen: v6e
topology: v6e:2x2x1
jax: 0.10.0
libtpu: 0.0.40
codegen_flags: <defaults>
</compile_context>

<pallas_src>
import jax
import jax.numpy as jnp
from jax import lax
from jax.experimental import pallas as pl
from jax.experimental.pallas import tpu as pltpu


_ROWS_PER_STEP = 8      # sublane rows of ids/output handled per grid step
_TABLE_CHUNK = 256      # table rows per one-hot matmul chunk


def _round_up(x, m):
    return (x + m - 1) // m * m


def _make_mf_kernel(chunk, mxu_dtype):
    """Builds the kernel body; `chunk` / `mxu_dtype` are trace-time constants."""

    def gather_dot(tab_ref, ids_row, tb):
        # tab_ref: (N, F) VMEM-resident table; ids_row: (1, TB) int32.
        # Returns (F, TB) f32 = gathered rows (transposed) via one-hot matmul.
        n_rows, f = tab_ref.shape

        def one_chunk(base, size):
            sub = tab_ref[pl.ds(base, size), :]                      # (size, F)
            if mxu_dtype is not None:
                sub = sub.astype(mxu_dtype)
            row_idx = lax.broadcasted_iota(jnp.int32, (size, tb), 0) + base
            oh = (row_idx == ids_row).astype(sub.dtype)              # (size, TB)
            # sub^T @ oh on the MXU -> (F, TB), accumulated in f32.
            return lax.dot_general(sub, oh, (((0,), (0,)), ((), ())),
                                   preferred_element_type=jnp.float32)

        if n_rows <= chunk:
            # Small table: single one-hot matmul.
            return one_chunk(0, n_rows)

        # Medium table: loop over CHUNK-row slices, accumulate the (F, TB)
        # partial gather. Wrapper pads the table to a multiple of `chunk`.
        n_chunks = n_rows // chunk

        def body(c, acc):
            base = pl.multiple_of(c * chunk, chunk)
            return acc + one_chunk(base, chunk)

        return lax.fori_loop(0, n_chunks, body,
                             jnp.zeros((f, tb), jnp.float32),
                             unroll=(n_chunks <= 4))

    def kernel(uid_ref, mid_ref, u_tab_ref, m_tab_ref, o_ref):
        # uid_ref / mid_ref : (8, TB) int32 id blocks for this batch tile
        # u_tab_ref         : (Nu, F) f32, whole table resident in VMEM
        # m_tab_ref         : (Nm, F) f32, whole table resident in VMEM
        # o_ref             : (8, TB) f32 lane-dense dot products
        rb, tb = uid_ref.shape
        rows = []
        for r in range(rb):                          # RB = 8, fully unrolled
            uid_r = uid_ref[r:r + 1, :]              # (1, TB)
            mid_r = mid_ref[r:r + 1, :]              # (1, TB)
            gu = gather_dot(u_tab_ref, uid_r, tb)    # (F, TB) f32
            gm = gather_dot(m_tab_ref, mid_r, tb)    # (F, TB) f32
            # VPU product, sublane (XLU) reduce over factors -> (1, TB).
            rows.append(jnp.sum(gu * gm, axis=0, keepdims=True))
        # Single full (8, TB) unmasked tile store.
        o_ref[...] = jnp.concatenate(rows, axis=0)

    return kernel


def matrix_factorization_forward(user_ids, movie_ids, user_emb, movie_emb, *,
                                 lanes_per_step=128, mxu_dtype=None):
    """Pallas equivalent of MatrixFactorization.forward.

    user_ids, movie_ids : int [B]
    user_emb            : f32 [num_users, n_factors]
    movie_emb           : f32 [num_movies, n_factors]
    returns             : f32 [B]
    """
    B = int(user_ids.shape[0])
    nu, F = user_emb.shape
    nm, fm = movie_emb.shape
    assert F == fm

    rb = _ROWS_PER_STEP
    tb = max(128, _round_up(int(lanes_per_step), 128))
    per_step = rb * tb                       # batch elements per grid step
    num_tiles = pl.cdiv(B, per_step)
    bp = num_tiles * per_step

    uid = jnp.pad(user_ids.astype(jnp.int32),
                  (0, bp - B)).reshape(num_tiles * rb, tb)
    mid = jnp.pad(movie_ids.astype(jnp.int32),
                  (0, bp - B)).reshape(num_tiles * rb, tb)

    # Pad tables to a multiple of the chunk size when the chunked gather is
    # used (padded rows have indices >= valid id range -> never matched).
    def pad_table(tab):
        n = tab.shape[0]
        if n > _TABLE_CHUNK:
            n_pad = _round_up(n, _TABLE_CHUNK)
            if n_pad != n:
                tab = jnp.pad(tab, ((0, n_pad - n), (0, 0)))
        return tab

    u_tab = pad_table(user_emb.astype(jnp.float32))
    m_tab = pad_table(movie_emb.astype(jnp.float32))
    nu_p, nm_p = u_tab.shape[0], m_tab.shape[0]

    # VMEM budget: single resident table copy + double-buffered id/out blocks
    # + one-hot / gathered intermediates.  Cap at 48 MiB for v7x headroom.
    table_bytes = (nu_p + nm_p) * F * 4
    block_bytes = 2 * (2 * rb * tb * 4) + 2 * (rb * tb * 4)
    inter_bytes = (min(nu_p, _TABLE_CHUNK) + min(nm_p, _TABLE_CHUNK)) * tb * 4 \
        + 2 * F * tb * 4
    vmem_limit = int(min(48 * 1024 * 1024,
                         max(32 * 1024 * 1024,
                             table_bytes + block_bytes + 4 * inter_bytes)))

    kernel = _make_mf_kernel(_TABLE_CHUNK, mxu_dtype)

    out = pl.pallas_call(
        kernel,
        out_shape=jax.ShapeDtypeStruct((num_tiles * rb, tb), jnp.float32),
        grid=(num_tiles,),
        in_specs=[
            pl.BlockSpec((rb, tb), lambda i: (i, 0)),       # user id block
            pl.BlockSpec((rb, tb), lambda i: (i, 0)),       # movie id block
            # Whole-table, single-copy VMEM residency (no double buffering).
            pl.BlockSpec(memory_space=pltpu.MemorySpace.VMEM),
            pl.BlockSpec(memory_space=pltpu.MemorySpace.VMEM),
        ],
        out_specs=pl.BlockSpec((rb, tb), lambda i: (i, 0)),
        compiler_params=pltpu.CompilerParams(
            dimension_semantics=("parallel",),
            vmem_limit_bytes=vmem_limit,
        ),
        cost_estimate=pl.CostEstimate(
            flops=2 * (nu_p + nm_p) * F * bp + 2 * F * bp,
            transcendentals=0,
            bytes_accessed=table_bytes + 3 * bp * 4,
        ),
    )(uid, mid, u_tab, m_tab)

    return out.reshape(bp)[:B]


if __name__ == "__main__":
    key = jax.random.PRNGKey(0)
    keys = jax.random.split(key, 10)

    # Small configuration consistent with the module (n_factors kept small).
    num_users, num_movies, n_factors = 16, 24, 32
    # nn.Embedding default init: N(0, 1)
    user_emb = jax.random.normal(keys[0], (num_users, n_factors), jnp.float32)
    movie_emb = jax.random.normal(keys[1], (num_movies, n_factors), jnp.float32)

    def ref_fn(ue, me, uids, mids):
        return jnp.sum(ue[uids] * me[mids], axis=1)

    # Case 1: tiny batch (module-scale smoke test).
    b1 = 8
    uid1 = jax.random.randint(keys[2], (b1,), 0, num_users, jnp.int32)
    mid1 = jax.random.randint(keys[3], (b1,), 0, num_movies, jnp.int32)
    out1 = jax.block_until_ready(
        matrix_factorization_forward(uid1, mid1, user_emb, movie_emb))
    assert out1.shape == (b1,)
    assert jnp.allclose(out1, ref_fn(user_emb, movie_emb, uid1, mid1),
                        atol=1e-5, rtol=1e-5)

    # Case 2: multi-tile batch (exercises padding + several grid steps).
    b2 = 2500
    uid2 = jax.random.randint(keys[4], (b2,), 0, num_users, jnp.int32)
    mid2 = jax.random.randint(keys[5], (b2,), 0, num_movies, jnp.int32)
    out2 = jax.block_until_ready(
        matrix_factorization_forward(uid2, mid2, user_emb, movie_emb))
    assert out2.shape == (b2,)
    assert jnp.allclose(out2, ref_fn(user_emb, movie_emb, uid2, mid2),
                        atol=1e-5, rtol=1e-5)

    # Case 3: user table larger than one chunk -> exercises the chunked
    # one-hot gather path (384 rows padded to 512 -> 2 chunks).
    num_users3, num_movies3 = 384, 40
    u_emb3 = jax.random.normal(keys[6], (num_users3, n_factors), jnp.float32)
    m_emb3 = jax.random.normal(keys[7], (num_movies3, n_factors), jnp.float32)
    b3 = 300
    uid3 = jax.random.randint(keys[8], (b3,), 0, num_users3, jnp.int32)
    mid3 = jax.random.randint(keys[9], (b3,), 0, num_movies3, jnp.int32)
    out3 = jax.block_until_ready(
        matrix_factorization_forward(uid3, mid3, u_emb3, m_emb3))
    assert out3.shape == (b3,)
    assert jnp.allclose(out3, ref_fn(u_emb3, m_emb3, uid3, mid3),
                        atol=1e-5, rtol=1e-5)

    print("KERNEL_OK")
</pallas_src>

<mosaic_0001>
module attributes {stable_mosaic.version = 11 : i64} {
  func.func @kernel(%arg0: i32, %arg1: memref<8x128xi32, #tpu.memory_space<vmem>>, %arg2: memref<8x128xi32, #tpu.memory_space<vmem>>, %arg3: memref<16x32xf32, #tpu.memory_space<vmem>>, %arg4: memref<24x32xf32, #tpu.memory_space<vmem>>, %arg5: memref<8x128xf32, #tpu.memory_space<vmem>>) attributes {dimension_semantics = [#tpu.dimension_semantics<parallel>], iteration_bounds = array<i64: 1>, scalar_prefetch = 0 : i64, scratch_operands = 0 : i64, tpu.core_type = #tpu.core_type<tc>, window_params = [{transform_indices = @transform_0, window_bounds = array<i64: 8, 128>}, {transform_indices = @transform_1, window_bounds = array<i64: 8, 128>}, {pipeline_mode = #tpu.pipeline_mode<synchronous>, transform_indices = @transform_2, window_bounds = array<i64: 16, 32>}, {pipeline_mode = #tpu.pipeline_mode<synchronous>, transform_indices = @transform_3, window_bounds = array<i64: 24, 32>}, {transform_indices = @transform_4, window_bounds = array<i64: 8, 128>}]} {
    %c0 = arith.constant 0 : index
    %c0_0 = arith.constant 0 : index
    %0 = vector.load %arg1[%c0, %c0_0] : memref<8x128xi32, #tpu.memory_space<vmem>>, vector<1x128xi32>
    %c0_1 = arith.constant 0 : index
    %c0_2 = arith.constant 0 : index
    %1 = vector.load %arg2[%c0_1, %c0_2] : memref<8x128xi32, #tpu.memory_space<vmem>>, vector<1x128xi32>
    %c0_3 = arith.constant 0 : index
    %c0_4 = arith.constant 0 : index
    %2 = vector.load %arg3[%c0_3, %c0_4] : memref<16x32xf32, #tpu.memory_space<vmem>>, vector<16x32xf32>
    %3 = tpu.iota {dimensions = array<i32: 0>} : vector<16x128xi32>
    %c0_i32 = arith.constant 0 : i32
    %4 = vector.broadcast %c0_i32 : i32 to vector<16x128xi32>
    %5 = arith.addi %3, %4 : vector<16x128xi32>
    %6 = vector.broadcast %0 : vector<1x128xi32> to vector<16x128xi32>
    %7 = arith.cmpi eq, %5, %6 : vector<16x128xi32>
    %8 = arith.extui %7 : vector<16x128xi1> to vector<16x128xi32>
    %9 = arith.sitofp %8 : vector<16x128xi32> to vector<16x128xf32>
    %cst = arith.constant dense<0.000000e+00> : vector<32x128xf32>
    %10 = tpu.matmul %2, %9, %cst {dimension_numbers = #tpu.dot_dimension_numbers<[0], [0], [1], [1], [0, 1, 1, 1], [], []>} : vector<16x32xf32>, vector<16x128xf32>, vector<32x128xf32> -> vector<32x128xf32>
    %c0_5 = arith.constant 0 : index
    %c0_6 = arith.constant 0 : index
    %11 = vector.load %arg4[%c0_5, %c0_6] : memref<24x32xf32, #tpu.memory_space<vmem>>, vector<24x32xf32>
    %12 = tpu.iota {dimensions = array<i32: 0>} : vector<24x128xi32>
    %c0_i32_7 = arith.constant 0 : i32
    %13 = vector.broadcast %c0_i32_7 : i32 to vector<24x128xi32>
    %14 = arith.addi %12, %13 : vector<24x128xi32>
    %15 = vector.broadcast %1 : vector<1x128xi32> to vector<24x128xi32>
    %16 = arith.cmpi eq, %14, %15 : vector<24x128xi32>
    %17 = arith.extui %16 : vector<24x128xi1> to vector<24x128xi32>
    %18 = arith.sitofp %17 : vector<24x128xi32> to vector<24x128xf32>
    %cst_8 = arith.constant dense<0.000000e+00> : vector<32x128xf32>
    %19 = tpu.matmul %11, %18, %cst_8 {dimension_numbers = #tpu.dot_dimension_numbers<[0], [0], [1], [1], [0, 1, 1, 1], [], []>} : vector<24x32xf32>, vector<24x128xf32>, vector<32x128xf32> -> vector<32x128xf32>
    %20 = arith.mulf %10, %19 : vector<32x128xf32>
    %cst_9 = arith.constant dense<0.000000e+00> : vector<128xf32>
    %21 = vector.multi_reduction <add>, %20, %cst_9 [0] : vector<32x128xf32> to vector<128xf32>
    %22 = vector.shape_cast %21 : vector<128xf32> to vector<1x128xf32>
    %c1 = arith.constant 1 : index
    %c0_10 = arith.constant 0 : index
    %23 = vector.load %arg1[%c1, %c0_10] : memref<8x128xi32, #tpu.memory_space<vmem>>, vector<1x128xi32>
    %c1_11 = arith.constant 1 : index
    %c0_12 = arith.constant 0 : index
    %24 = vector.load %arg2[%c1_11, %c0_12] : memref<8x128xi32, #tpu.memory_space<vmem>>, vector<1x128xi32>
    %c0_13 = arith.constant 0 : index
    %c0_14 = arith.constant 0 : index
    %25 = vector.load %arg3[%c0_13, %c0_14] : memref<16x32xf32, #tpu.memory_space<vmem>>, vector<16x32xf32>
    %26 = tpu.iota {dimensions = array<i32: 0>} : vector<16x128xi32>
    %c0_i32_15 = arith.constant 0 : i32
    %27 = vector.broadcast %c0_i32_15 : i32 to vector<16x128xi32>
    %28 = arith.addi %26, %27 : vector<16x128xi32>
    %29 = vector.broadcast %23 : vector<1x128xi32> to vector<16x128xi32>
    %30 = arith.cmpi eq, %28, %29 : vector<16x128xi32>
    %31 = arith.extui %30 : vector<16x128xi1> to vector<16x128xi32>
    %32 = arith.sitofp %31 : vector<16x128xi32> to vector<16x128xf32>
    %cst_16 = arith.constant dense<0.000000e+00> : vector<32x128xf32>
    %33 = tpu.matmul %25, %32, %cst_16 {dimension_numbers = #tpu.dot_dimension_numbers<[0], [0], [1], [1], [0, 1, 1, 1], [], []>} : vector<16x32xf32>, vector<16x128xf32>, vector<32x128xf32> -> vector<32x128xf32>
    %c0_17 = arith.constant 0 : index
    %c0_18 = arith.constant 0 : index
    %34 = vector.load %arg4[%c0_17, %c0_18] : memref<24x32xf32, #tpu.memory_space<vmem>>, vector<24x32xf32>
    %35 = tpu.iota {dimensions = array<i32: 0>} : vector<24x128xi32>
    %c0_i32_19 = arith.constant 0 : i32
    %36 = vector.broadcast %c0_i32_19 : i32 to vector<24x128xi32>
    %37 = arith.addi %35, %36 : vector<24x128xi32>
    %38 = vector.broadcast %24 : vector<1x128xi32> to vector<24x128xi32>
    %39 = arith.cmpi eq, %37, %38 : vector<24x128xi32>
    %40 = arith.extui %39 : vector<24x128xi1> to vector<24x128xi32>
    %41 = arith.sitofp %40 : vector<24x128xi32> to vector<24x128xf32>
    %cst_20 = arith.constant dense<0.000000e+00> : vector<32x128xf32>
    %42 = tpu.matmul %34, %41, %cst_20 {dimension_numbers = #tpu.dot_dimension_numbers<[0], [0], [1], [1], [0, 1, 1, 1], [], []>} : vector<24x32xf32>, vector<24x128xf32>, vector<32x128xf32> -> vector<32x128xf32>
    %43 = arith.mulf %33, %42 : vector<32x128xf32>
    %cst_21 = arith.constant dense<0.000000e+00> : vector<128xf32>
    %44 = vector.multi_reduction <add>, %43, %cst_21 [0] : vector<32x128xf32> to vector<128xf32>
    %45 = vector.shape_cast %44 : vector<128xf32> to vector<1x128xf32>
    %c2 = arith.constant 2 : index
    %c0_22 = arith.constant 0 : index
    %46 = vector.load %arg1[%c2, %c0_22] : memref<8x128xi32, #tpu.memory_space<vmem>>, vector<1x128xi32>
    %c2_23 = arith.constant 2 : index
    %c0_24 = arith.constant 0 : index
    %47 = vector.load %arg2[%c2_23, %c0_24] : memref<8x128xi32, #tpu.memory_space<vmem>>, vector<1x128xi32>
    %c0_25 = arith.constant 0 : index
    %c0_26 = arith.constant 0 : index
    %48 = vector.load %arg3[%c0_25, %c0_26] : memref<16x32xf32, #tpu.memory_space<vmem>>, vector<16x32xf32>
    %49 = tpu.iota {dimensions = array<i32: 0>} : vector<16x128xi32>
    %c0_i32_27 = arith.constant 0 : i32
    %50 = vector.broadcast %c0_i32_27 : i32 to vector<16x128xi32>
    %51 = arith.addi %49, %50 : vector<16x128xi32>
    %52 = vector.broadcast %46 : vector<1x128xi32> to vector<16x128xi32>
    %53 = arith.cmpi eq, %51, %52 : vector<16x128xi32>
    %54 = arith.extui %53 : vector<16x128xi1> to vector<16x128xi32>
    %55 = arith.sitofp %54 : vector<16x128xi32> to vector<16x128xf32>
    %cst_28 = arith.constant dense<0.000000e+00> : vector<32x128xf32>
    %56 = tpu.matmul %48, %55, %cst_28 {dimension_numbers = #tpu.dot_dimension_numbers<[0], [0], [1], [1], [0, 1, 1, 1], [], []>} : vector<16x32xf32>, vector<16x128xf32>, vector<32x128xf32> -> vector<32x128xf32>
    %c0_29 = arith.constant 0 : index
    %c0_30 = arith.constant 0 : index
    %57 = vector.load %arg4[%c0_29, %c0_30] : memref<24x32xf32, #tpu.memory_space<vmem>>, vector<24x32xf32>
    %58 = tpu.iota {dimensions = array<i32: 0>} : vector<24x128xi32>
    %c0_i32_31 = arith.constant 0 : i32
    %59 = vector.broadcast %c0_i32_31 : i32 to vector<24x128xi32>
    %60 = arith.addi %58, %59 : vector<24x128xi32>
    %61 = vector.broadcast %47 : vector<1x128xi32> to vector<24x128xi32>
    %62 = arith.cmpi eq, %60, %61 : vector<24x128xi32>
    %63 = arith.extui %62 : vector<24x128xi1> to vector<24x128xi32>
    %64 = arith.sitofp %63 : vector<24x128xi32> to vector<24x128xf32>
    %cst_32 = arith.constant dense<0.000000e+00> : vector<32x128xf32>
    %65 = tpu.matmul %57, %64, %cst_32 {dimension_numbers = #tpu.dot_dimension_numbers<[0], [0], [1], [1], [0, 1, 1, 1], [], []>} : vector<24x32xf32>, vector<24x128xf32>, vector<32x128xf32> -> vector<32x128xf32>
    %66 = arith.mulf %56, %65 : vector<32x128xf32>
    %cst_33 = arith.constant dense<0.000000e+00> : vector<128xf32>
    %67 = vector.multi_reduction <add>, %66, %cst_33 [0] : vector<32x128xf32> to vector<128xf32>
    %68 = vector.shape_cast %67 : vector<128xf32> to vector<1x128xf32>
    %c3 = arith.constant 3 : index
    %c0_34 = arith.constant 0 : index
    %69 = vector.load %arg1[%c3, %c0_34] : memref<8x128xi32, #tpu.memory_space<vmem>>, vector<1x128xi32>
    %c3_35 = arith.constant 3 : index
    %c0_36 = arith.constant 0 : index
    %70 = vector.load %arg2[%c3_35, %c0_36] : memref<8x128xi32, #tpu.memory_space<vmem>>, vector<1x128xi32>
    %c0_37 = arith.constant 0 : index
    %c0_38 = arith.constant 0 : index
    %71 = vector.load %arg3[%c0_37, %c0_38] : memref<16x32xf32, #tpu.memory_space<vmem>>, vector<16x32xf32>
    %72 = tpu.iota {dimensions = array<i32: 0>} : vector<16x128xi32>
    %c0_i32_39 = arith.constant 0 : i32
    %73 = vector.broadcast %c0_i32_39 : i32 to vector<16x128xi32>
    %74 = arith.addi %72, %73 : vector<16x128xi32>
    %75 = vector.broadcast %69 : vector<1x128xi32> to vector<16x128xi32>
    %76 = arith.cmpi eq, %74, %75 : vector<16x128xi32>
    %77 = arith.extui %76 : vector<16x128xi1> to vector<16x128xi32>
    %78 = arith.sitofp %77 : vector<16x128xi32> to vector<16x128xf32>
    %cst_40 = arith.constant dense<0.000000e+00> : vector<32x128xf32>
    %79 = tpu.matmul %71, %78, %cst_40 {dimension_numbers = #tpu.dot_dimension_numbers<[0], [0], [1], [1], [0, 1, 1, 1], [], []>} : vector<16x32xf32>, vector<16x128xf32>, vector<32x128xf32> -> vector<32x128xf32>
    %c0_41 = arith.constant 0 : index
    %c0_42 = arith.constant 0 : index
    %80 = vector.load %arg4[%c0_41, %c0_42] : memref<24x32xf32, #tpu.memory_space<vmem>>, vector<24x32xf32>
    %81 = tpu.iota {dimensions = array<i32: 0>} : vector<24x128xi32>
    %c0_i32_43 = arith.constant 0 : i32
    %82 = vector.broadcast %c0_i32_43 : i32 to vector<24x128xi32>
    %83 = arith.addi %81, %82 : vector<24x128xi32>
    %84 = vector.broadcast %70 : vector<1x128xi32> to vector<24x128xi32>
    %85 = arith.cmpi eq, %83, %84 : vector<24x128xi32>
    %86 = arith.extui %85 : vector<24x128xi1> to vector<24x128xi32>
    %87 = arith.sitofp %86 : vector<24x128xi32> to vector<24x128xf32>
    %cst_44 = arith.constant dense<0.000000e+00> : vector<32x128xf32>
    %88 = tpu.matmul %80, %87, %cst_44 {dimension_numbers = #tpu.dot_dimension_numbers<[0], [0], [1], [1], [0, 1, 1, 1], [], []>} : vector<24x32xf32>, vector<24x128xf32>, vector<32x128xf32> -> vector<32x128xf32>
    %89 = arith.mulf %79, %88 : vector<32x128xf32>
    %cst_45 = arith.constant dense<0.000000e+00> : vector<128xf32>
    %90 = vector.multi_reduction <add>, %89, %cst_45 [0] : vector<32x128xf32> to vector<128xf32>
    %91 = vector.shape_cast %90 : vector<128xf32> to vector<1x128xf32>
    %c4 = arith.constant 4 : index
    %c0_46 = arith.constant 0 : index
    %92 = vector.load %arg1[%c4, %c0_46] : memref<8x128xi32, #tpu.memory_space<vmem>>, vector<1x128xi32>
    %c4_47 = arith.constant 4 : index
    %c0_48 = arith.constant 0 : index
    %93 = vector.load %arg2[%c4_47, %c0_48] : memref<8x128xi32, #tpu.memory_space<vmem>>, vector<1x128xi32>
    %c0_49 = arith.constant 0 : index
    %c0_50 = arith.constant 0 : index
    %94 = vector.load %arg3[%c0_49, %c0_50] : memref<16x32xf32, #tpu.memory_space<vmem>>, vector<16x32xf32>
    %95 = tpu.iota {dimensions = array<i32: 0>} : vector<16x128xi32>
    %c0_i32_51 = arith.constant 0 : i32
    %96 = vector.broadcast %c0_i32_51 : i32 to vector<16x128xi32>
    %97 = arith.addi %95, %96 : vector<16x128xi32>
    %98 = vector.broadcast %92 : vector<1x128xi32> to vector<16x128xi32>
    %99 = arith.cmpi eq, %97, %98 : vector<16x128xi32>
    %100 = arith.extui %99 : vector<16x128xi1> to vector<16x128xi32>
    %101 = arith.sitofp %100 : vector<16x128xi32> to vector<16x128xf32>
    %cst_52 = arith.constant dense<0.000000e+00> : vector<32x128xf32>
    %102 = tpu.matmul %94, %101, %cst_52 {dimension_numbers = #tpu.dot_dimension_numbers<[0], [0], [1], [1], [0, 1, 1, 1], [], []>} : vector<16x32xf32>, vector<16x128xf32>, vector<32x128xf32> -> vector<32x128xf32>
    %c0_53 = arith.constant 0 : index
    %c0_54 = arith.constant 0 : index
    %103 = vector.load %arg4[%c0_53, %c0_54] : memref<24x32xf32, #tpu.memory_space<vmem>>, vector<24x32xf32>
    %104 = tpu.iota {dimensions = array<i32: 0>} : vector<24x128xi32>
    %c0_i32_55 = arith.constant 0 : i32
    %105 = vector.broadcast %c0_i32_55 : i32 to vector<24x128xi32>
    %106 = arith.addi %104, %105 : vector<24x128xi32>
    %107 = vector.broadcast %93 : vector<1x128xi32> to vector<24x128xi32>
    %108 = arith.cmpi eq, %106, %107 : vector<24x128xi32>
    %109 = arith.extui %108 : vector<24x128xi1> to vector<24x128xi32>
    %110 = arith.sitofp %109 : vector<24x128xi32> to vector<24x128xf32>
    %cst_56 = arith.constant dense<0.000000e+00> : vector<32x128xf32>
    %111 = tpu.matmul %103, %110, %cst_56 {dimension_numbers = #tpu.dot_dimension_numbers<[0], [0], [1], [1], [0, 1, 1, 1], [], []>} : vector<24x32xf32>, vector<24x128xf32>, vector<32x128xf32> -> vector<32x128xf32>
    %112 = arith.mulf %102, %111 : vector<32x128xf32>
    %cst_57 = arith.constant dense<0.000000e+00> : vector<128xf32>
    %113 = vector.multi_reduction <add>, %112, %cst_57 [0] : vector<32x128xf32> to vector<128xf32>
    %114 = vector.shape_cast %113 : vector<128xf32> to vector<1x128xf32>
    %c5 = arith.constant 5 : index
    %c0_58 = arith.constant 0 : index
    %115 = vector.load %arg1[%c5, %c0_58] : memref<8x128xi32, #tpu.memory_space<vmem>>, vector<1x128xi32>
    %c5_59 = arith.constant 5 : index
    %c0_60 = arith.constant 0 : index
    %116 = vector.load %arg2[%c5_59, %c0_60] : memref<8x128xi32, #tpu.memory_space<vmem>>, vector<1x128xi32>
    %c0_61 = arith.constant 0 : index
    %c0_62 = arith.constant 0 : index
    %117 = vector.load %arg3[%c0_61, %c0_62] : memref<16x32xf32, #tpu.memory_space<vmem>>, vector<16x32xf32>
    %118 = tpu.iota {dimensions = array<i32: 0>} : vector<16x128xi32>
    %c0_i32_63 = arith.constant 0 : i32
    %119 = vector.broadcast %c0_i32_63 : i32 to vector<16x128xi32>
    %120 = arith.addi %118, %119 : vector<16x128xi32>
    %121 = vector.broadcast %115 : vector<1x128xi32> to vector<16x128xi32>
    %122 = arith.cmpi eq, %120, %121 : vector<16x128xi32>
    %123 = arith.extui %122 : vector<16x128xi1> to vector<16x128xi32>
    %124 = arith.sitofp %123 : vector<16x128xi32> to vector<16x128xf32>
    %cst_64 = arith.constant dense<0.000000e+00> : vector<32x128xf32>
    %125 = tpu.matmul %117, %124, %cst_64 {dimension_numbers = #tpu.dot_dimension_numbers<[0], [0], [1], [1], [0, 1, 1, 1], [], []>} : vector<16x32xf32>, vector<16x128xf32>, vector<32x128xf32> -> vector<32x128xf32>
    %c0_65 = arith.constant 0 : index
    %c0_66 = arith.constant 0 : index
    %126 = vector.load %arg4[%c0_65, %c0_66] : memref<24x32xf32, #tpu.memory_space<vmem>>, vector<24x32xf32>
    %127 = tpu.iota {dimensions = array<i32: 0>} : vector<24x128xi32>
    %c0_i32_67 = arith.constant 0 : i32
    %128 = vector.broadcast %c0_i32_67 : i32 to vector<24x128xi32>
    %129 = arith.addi %127, %128 : vector<24x128xi32>
    %130 = vector.broadcast %116 : vector<1x128xi32> to vector<24x128xi32>
    %131 = arith.cmpi eq, %129, %130 : vector<24x128xi32>
    %132 = arith.extui %131 : vector<24x128xi1> to vector<24x128xi32>
    %133 = arith.sitofp %132 : vector<24x128xi32> to vector<24x128xf32>
    %cst_68 = arith.constant dense<0.000000e+00> : vector<32x128xf32>
    %134 = tpu.matmul %126, %133, %cst_68 {dimension_numbers = #tpu.dot_dimension_numbers<[0], [0], [1], [1], [0, 1, 1, 1], [], []>} : vector<24x32xf32>, vector<24x128xf32>, vector<32x128xf32> -> vector<32x128xf32>
    %135 = arith.mulf %125, %134 : vector<32x128xf32>
    %cst_69 = arith.constant dense<0.000000e+00> : vector<128xf32>
    %136 = vector.multi_reduction <add>, %135, %cst_69 [0] : vector<32x128xf32> to vector<128xf32>
    %137 = vector.shape_cast %136 : vector<128xf32> to vector<1x128xf32>
    %c6 = arith.constant 6 : index
    %c0_70 = arith.constant 0 : index
    %138 = vector.load %arg1[%c6, %c0_70] : memref<8x128xi32, #tpu.memory_space<vmem>>, vector<1x128xi32>
    %c6_71 = arith.constant 6 : index
    %c0_72 = arith.constant 0 : index
    %139 = vector.load %arg2[%c6_71, %c0_72] : memref<8x128xi32, #tpu.memory_space<vmem>>, vector<1x128xi32>
    %c0_73 = arith.constant 0 : index
    %c0_74 = arith.constant 0 : index
    %140 = vector.load %arg3[%c0_73, %c0_74] : memref<16x32xf32, #tpu.memory_space<vmem>>, vector<16x32xf32>
    %141 = tpu.iota {dimensions = array<i32: 0>} : vector<16x128xi32>
    %c0_i32_75 = arith.constant 0 : i32
    %142 = vector.broadcast %c0_i32_75 : i32 to vector<16x128xi32>
    %143 = arith.addi %141, %142 : vector<16x128xi32>
    %144 = vector.broadcast %138 : vector<1x128xi32> to vector<16x128xi32>
    %145 = arith.cmpi eq, %143, %144 : vector<16x128xi32>
    %146 = arith.extui %145 : vector<16x128xi1> to vector<16x128xi32>
    %147 = arith.sitofp %146 : vector<16x128xi32> to vector<16x128xf32>
    %cst_76 = arith.constant dense<0.000000e+00> : vector<32x128xf32>
    %148 = tpu.matmul %140, %147, %cst_76 {dimension_numbers = #tpu.dot_dimension_numbers<[0], [0], [1], [1], [0, 1, 1, 1], [], []>} : vector<16x32xf32>, vector<16x128xf32>, vector<32x128xf32> -> vector<32x128xf32>
    %c0_77 = arith.constant 0 : index
    %c0_78 = arith.constant 0 : index
    %149 = vector.load %arg4[%c0_77, %c0_78] : memref<24x32xf32, #tpu.memory_space<vmem>>, vector<24x32xf32>
    %150 = tpu.iota {dimensions = array<i32: 0>} : vector<24x128xi32>
    %c0_i32_79 = arith.constant 0 : i32
    %151 = vector.broadcast %c0_i32_79 : i32 to vector<24x128xi32>
    %152 = arith.addi %150, %151 : vector<24x128xi32>
    %153 = vector.broadcast %139 : vector<1x128xi32> to vector<24x128xi32>
    %154 = arith.cmpi eq, %152, %153 : vector<24x128xi32>
    %155 = arith.extui %154 : vector<24x128xi1> to vector<24x128xi32>
    %156 = arith.sitofp %155 : vector<24x128xi32> to vector<24x128xf32>
    %cst_80 = arith.constant dense<0.000000e+00> : vector<32x128xf32>
    %157 = tpu.matmul %149, %156, %cst_80 {dimension_numbers = #tpu.dot_dimension_numbers<[0], [0], [1], [1], [0, 1, 1, 1], [], []>} : vector<24x32xf32>, vector<24x128xf32>, vector<32x128xf32> -> vector<32x128xf32>
    %158 = arith.mulf %148, %157 : vector<32x128xf32>
    %cst_81 = arith.constant dense<0.000000e+00> : vector<128xf32>
    %159 = vector.multi_reduction <add>, %158, %cst_81 [0] : vector<32x128xf32> to vector<128xf32>
    %160 = vector.shape_cast %159 : vector<128xf32> to vector<1x128xf32>
    %c7 = arith.constant 7 : index
    %c0_82 = arith.constant 0 : index
    %161 = vector.load %arg1[%c7, %c0_82] : memref<8x128xi32, #tpu.memory_space<vmem>>, vector<1x128xi32>
    %c7_83 = arith.constant 7 : index
    %c0_84 = arith.constant 0 : index
    %162 = vector.load %arg2[%c7_83, %c0_84] : memref<8x128xi32, #tpu.memory_space<vmem>>, vector<1x128xi32>
    %c0_85 = arith.constant 0 : index
    %c0_86 = arith.constant 0 : index
    %163 = vector.load %arg3[%c0_85, %c0_86] : memref<16x32xf32, #tpu.memory_space<vmem>>, vector<16x32xf32>
    %164 = tpu.iota {dimensions = array<i32: 0>} : vector<16x128xi32>
    %c0_i32_87 = arith.constant 0 : i32
    %165 = vector.broadcast %c0_i32_87 : i32 to vector<16x128xi32>
    %166 = arith.addi %164, %165 : vector<16x128xi32>
    %167 = vector.broadcast %161 : vector<1x128xi32> to vector<16x128xi32>
    %168 = arith.cmpi eq, %166, %167 : vector<16x128xi32>
    %169 = arith.extui %168 : vector<16x128xi1> to vector<16x128xi32>
    %170 = arith.sitofp %169 : vector<16x128xi32> to vector<16x128xf32>
    %cst_88 = arith.constant dense<0.000000e+00> : vector<32x128xf32>
    %171 = tpu.matmul %163, %170, %cst_88 {dimension_numbers = #tpu.dot_dimension_numbers<[0], [0], [1], [1], [0, 1, 1, 1], [], []>} : vector<16x32xf32>, vector<16x128xf32>, vector<32x128xf32> -> vector<32x128xf32>
    %c0_89 = arith.constant 0 : index
    %c0_90 = arith.constant 0 : index
    %172 = vector.load %arg4[%c0_89, %c0_90] : memref<24x32xf32, #tpu.memory_space<vmem>>, vector<24x32xf32>
    %173 = tpu.iota {dimensions = array<i32: 0>} : vector<24x128xi32>
    %c0_i32_91 = arith.constant 0 : i32
    %174 = vector.broadcast %c0_i32_91 : i32 to vector<24x128xi32>
    %175 = arith.addi %173, %174 : vector<24x128xi32>
    %176 = vector.broadcast %162 : vector<1x128xi32> to vector<24x128xi32>
    %177 = arith.cmpi eq, %175, %176 : vector<24x128xi32>
    %178 = arith.extui %177 : vector<24x128xi1> to vector<24x128xi32>
    %179 = arith.sitofp %178 : vector<24x128xi32> to vector<24x128xf32>
    %cst_92 = arith.constant dense<0.000000e+00> : vector<32x128xf32>
    %180 = tpu.matmul %172, %179, %cst_92 {dimension_numbers = #tpu.dot_dimension_numbers<[0], [0], [1], [1], [0, 1, 1, 1], [], []>} : vector<24x32xf32>, vector<24x128xf32>, vector<32x128xf32> -> vector<32x128xf32>
    %181 = arith.mulf %171, %180 : vector<32x128xf32>
    %cst_93 = arith.constant dense<0.000000e+00> : vector<128xf32>
    %182 = vector.multi_reduction <add>, %181, %cst_93 [0] : vector<32x128xf32> to vector<128xf32>
    %183 = vector.shape_cast %182 : vector<128xf32> to vector<1x128xf32>
    %184 = tpu.concatenate %22, %45, %68, %91, %114, %137, %160, %183 in 0 : vector<1x128xf32>, vector<1x128xf32>, vector<1x128xf32>, vector<1x128xf32>, vector<1x128xf32>, vector<1x128xf32>, vector<1x128xf32>, vector<1x128xf32> -> vector<8x128xf32>
    %c0_94 = arith.constant 0 : index
    %c0_95 = arith.constant 0 : index
    %185 = vector.load %arg5[%c0_94, %c0_95] : memref<8x128xf32, #tpu.memory_space<vmem>>, vector<8x128xf32>
    tpu.vector_store %arg5[%c0_94, %c0_95], %184 {strides = array<i32>} : memref<8x128xf32, #tpu.memory_space<vmem>>, vector<8x128xf32>,
    return
  }
  func.func @transform_0(%arg0: i32) -> (i32, i32) {
    %c0_i32 = arith.constant 0 : i32
    %c0_i32_0 = arith.constant 0 : i32
    return %arg0, %c0_i32 : i32, i32
  }
  func.func @transform_1(%arg0: i32) -> (i32, i32) {
    %c0_i32 = arith.constant 0 : i32
    %c0_i32_0 = arith.constant 0 : i32
    return %arg0, %c0_i32 : i32, i32
  }
  func.func @transform_2(%arg0: i32) -> (i32, i32) {
    %c0_i32 = arith.constant 0 : i32
    %c0_i32_0 = arith.constant 0 : i32
    %c0_i32_1 = arith.constant 0 : i32
    return %c0_i32, %c0_i32_0 : i32, i32
  }
  func.func @transform_3(%arg0: i32) -> (i32, i32) {
    %c0_i32 = arith.constant 0 : i32
    %c0_i32_0 = arith.constant 0 : i32
    %c0_i32_1 = arith.constant 0 : i32
    return %c0_i32, %c0_i32_0 : i32, i32
  }
  func.func @transform_4(%arg0: i32) -> (i32, i32) {
    %c0_i32 = arith.constant 0 : i32
    %c0_i32_0 = arith.constant 0 : i32
    return %arg0, %c0_i32 : i32, i32
  }
}

</mosaic_0001>

<bundles_post_ra>
// kernel: tpu_custom_call.1
= control target key start
LH: loop header
LB: loop body
LE: loop exit
PB: predicated region body
PF: predicated region fallthrough
CT: control target
= control target key end

     0   :  { %9 = vsyncpa [#allocation3], 0  ;;  %s2771_s0 = inlined_call_operand.hbm [shape: s32[8,128], index: 0, kind: input, shape index: {}]   ;;  %s2772_s1 = inlined_call_operand.hbm [shape: s32[8,128], index: 1, kind: input, shape index: {}]   ;;  %s2773_s2 = inlined_call_operand.hbm [shape: f32[16,32], index: 2, kind: input, shape index: {}]   ;;  %s2774_s3 = inlined_call_operand.hbm [shape: f32[24,32], index: 3, kind: input, shape index: {}]   ;;  %s2775_s4 = inlined_call_operand.hbm [shape: f32[8,128], index: 4, kind: output, shape index: {}]  }
   0x1   :  { %10 = vsyncpa [#allocation6], 0 }
   0x2   :  { %11 = vsyncpa [#allocation9], 0 }
   0x3   :  { %12 = vsyncpa [#allocation4], 0  ;;  %s2421_s15 = smov [#allocation5]   ;;  %s2422_s17 = smov [#allocation2]  }
   0x4   :  { %s29_s16 = sshll.u32 %s2421_s15, 4  ;;  %s19_s18 = sshll.u32 %s2422_s17, 4  ;;  %s30_s16 = int_to_ptr.vmem [resolvable:$true] %s29_s16  ;;  %s20_s18 = int_to_ptr.vmem [resolvable:$true] %s19_s18 }
   0x5   :  { %s2321_s19 = scalar_lea.vmem %s30_s16, 128  ;;  %p2326_p1 = scmp.lt.s32.totalorder %s30_s16, %s30_s16 }
   0x6   :  { %p2322_p0 = scmp.ne.s32.totalorder %s30_s16, %s2321_s19  ;;  %p2327_p2 = scmp.lt.s32.totalorder %s2321_s19, %s2321_s19 }
   0x8   :  { %p2328_p3 = por %p2327_p2, %p2326_p1 }
   0xa   :  { %p2329_p4 = pnand %p2328_p3, %p2322_p0 }
   0xc   :  { %2332 = shalt.err (!%p2329_p4)
}
   0xd   :  { %32 = dma.hbm_to_vmem [thread:$0]  %s2772_s1, 128, %s30_s16, [#allocation6]  }
   0xe   :  { %s2341_s22 = scalar_lea.vmem %s20_s18, 128  ;;  %p2346_p6 = scmp.lt.s32.totalorder %s20_s18, %s20_s18 }
   0xf   :  { %p2342_p5 = scmp.ne.s32.totalorder %s20_s18, %s2341_s22  ;;  %p2347_p7 = scmp.lt.s32.totalorder %s2341_s22, %s2341_s22 }
  0x11   :  { %p2348_p8 = por %p2347_p7, %p2346_p6 }
  0x13   :  { %p2349_p9 = pnand %p2348_p8, %p2342_p5 }
  0x15   :  { %2352 = shalt.err (!%p2349_p9)
}
  0x16   :  { %22 = dma.hbm_to_vmem [thread:$0]  %s2771_s0, 128, %s20_s18, [#allocation3]  }
  0x17   :  { %s2423_s25 = smov [#allocation7]  }
  0x18   :  { %s38_s26 = sshll.u32 %s2423_s25, 4  ;;  %s39_s26 = int_to_ptr.vmem [resolvable:$true] %s38_s26 }
  0x19   :  { %s2361_s27 = scalar_lea.vmem %s39_s26, 256  ;;  %p2366_p11 = scmp.lt.s32.totalorder %s39_s26, %s39_s26 }
  0x1a   :  { %p2362_p10 = scmp.ne.s32.totalorder %s39_s26, %s2361_s27  ;;  %p2367_p12 = scmp.lt.s32.totalorder %s2361_s27, %s2361_s27 }
  0x1c   :  { %p2368_p13 = por %p2367_p12, %p2366_p11 }
  0x1e   :  { %p2369_p0 = pnand %p2368_p13, %p2362_p10 }
  0x20   :  { %2372 = shalt.err (!%p2369_p0)
}
  0x21   :  { %s2424_s1 = smov 128   ;;  %s2425_s28 = smov 8  }
  0x22   :  { %44 = dma.hbm_to_vmem [thread:$0]  %s2773_s2, 256, %s39_s26, [#allocation6], %s2424_s1, %s2424_s1, %s2425_s28  }
  0x23   :  { %s2426_s5 = smov [#allocation8]  }
  0x24   :  { %s50_s6 = sshll.u32 %s2426_s5, 4  ;;  %s51_s6 = int_to_ptr.vmem [resolvable:$true] %s50_s6 }
  0x25   :  { %s2381_s0 = scalar_lea.vmem %s51_s6, 384  ;;  %p2386_p2 = scmp.lt.s32.totalorder %s51_s6, %s51_s6 }
  0x26   :  { %p2382_p1 = scmp.ne.s32.totalorder %s51_s6, %s2381_s0  ;;  %p2387_p3 = scmp.lt.s32.totalorder %s2381_s0, %s2381_s0 }
  0x28   :  { %p2388_p4 = por %p2387_p3, %p2386_p2 }
  0x2a   :  { %p2389_p5 = pnand %p2388_p4, %p2382_p1 }
  0x2c   :  { %2392 = shalt.err (!%p2389_p5)
}
  0x2d   :  { %56 = dma.hbm_to_vmem [thread:$0]  %s2774_s3, 384, %s51_s6, [#allocation9], %s2424_s1, %s2424_s1, %s2425_s28  }
  0x2e   :  { %2413 = dma.done.wait [#allocation3], 128  }
  0x2f   :  { %2414 = vsyncadd [#allocation3], 4294967168 }
  0x30   :  { %2415 = dma.done.wait [#allocation6], 384  }
  0x31   :  { %2416 = vsyncadd [#allocation6], 4294966912 }
  0x32   :  { %2417 = dma.done.wait [#allocation9], 384  }
  0x33   :  { %2418 = vsyncadd [#allocation9], 4294966912  ;;  %v73_v0 = vlaneseq  ;;  %v216_v4 = vld [vmem:[#allocation8] sm:$0xff]  ;;  %v71_v5 = vld [vmem:[#allocation7] sm:$0xff]  ;;  %v2427_v10 = vmov 1.0   ;;  %vm118_vm8 = vcmask 130048  }
  0x34   :  { %233 = vxpose.xlu1.b32.start [1/3] (short) (narrow) %v216_v4, 32  ;;  %86 = vxpose.xlu0.b32.start [1/2] (short) (narrow) %v71_v5, 32  ;;  %v1873_v6 = vld [vmem:[#allocation5] ss:$0 sm:$0xff]  ;;  %v72_v8 = vld [vmem:[#allocation7 + $0x8] sm:$0xff]  ;;  %v218_v13 = vld [vmem:[#allocation8 + $0x10] sm:$0xff] }
  0x35   :  { %v2466_v1 = vshrl.u32 %v73_v0, 7  ;;  %v217_v7 = vld [vmem:[#allocation8 + $0x8] sm:$0xff]  ;;  %v1864_v9 = vld [vmem:[#allocation2] ss:$0 sm:$0xff]  ;;  %v1884_v11 = vld [vmem:[#allocation2 + $0x1] ss:$0 sm:$0xff] }
  0x36   :  { %v1893_v12 = vld [vmem:[#allocation5 + $0x1] ss:$0 sm:$0xff]  ;;  %vm265_vm9 = vcmask 195584   ;;  %v1904_v18 = vld [vmem:[#allocation2 + $0x2] ss:$0 sm:$0xff]  ;;  %s2428_s2 = smov [#allocation10]  }
  0x37   :  { %v2469_v2 = vadd.s32 16, %v2466_v1  ;;  %v2472_v3 = vadd.s32 8, %v2466_v1  ;;  %vm80_vm3 = vcmp.eq.s32.totalorder %v2466_v1, %v1864_v9  ;;  %vm224_vm4 = vcmp.eq.s32.totalorder %v2466_v1, %v1873_v6  ;;  %v1913_v19 = vld [vmem:[#allocation5 + $0x2] ss:$0 sm:$0xff]  ;;  %v1924_v24 = vld [vmem:[#allocation2 + $0x3] ss:$0 sm:$0xff] }
  0x38   :  { %234 = vxpose.xlu1.b32.cont [2/3] (short) (narrow) %v217_v7, 32  ;;  %87 = vxpose.xlu0.b32.end [2/2] (short) (narrow) %v72_v8, 32  ;;  %vm382_vm10 = vcmp.eq.s32.totalorder %v2466_v1, %v1884_v11  ;;  %vm477_vm11 = vcmp.eq.s32.totalorder %v2466_v1, %v1893_v12  ;;  %vm590_vm15 = vcmp.eq.s32.totalorder %v2466_v1, %v1904_v18  ;;  %v1933_v25 = vld [vmem:[#allocation5 + $0x3] ss:$0 sm:$0xff]  ;;  %v1944_v26 = vld [vmem:[#allocation2 + $0x4] ss:$0 sm:$0xff] }
  0x39   :  { %vm226_vm0 = vcmp.eq.s32.totalorder %v2469_v2, %v1873_v6  ;;  %vm81_vm1 = vcmp.eq.s32.totalorder %v2472_v3, %v1864_v9  ;;  %vm225_vm2 = vcmp.eq.s32.totalorder %v2472_v3, %v1873_v6  ;;  %vm478_vm5 = vcmp.eq.s32.totalorder %v2472_v3, %v1893_v12  ;;  %v1953_v27 = vld [vmem:[#allocation5 + $0x4] ss:$0 sm:$0xff]  ;;  %v1964_v28 = vld [vmem:[#allocation2 + $0x5] ss:$0 sm:$0xff]  ;;  %v1973_v29 = vld [vmem:[#allocation5 + $0x5] ss:$0 sm:$0xff] }
  0x3a   :  { %2138 = vmatprep.subr.msk.mxu1 %vm226_vm0, %v2427_v10  ;;  %2128 = vmatprep.subr.msk.mxu0 %vm81_vm1, %v2427_v10  ;;  %vm383_vm6 = vcmp.eq.s32.totalorder %v2472_v3, %v1884_v11  ;;  %vm479_vm7 = vcmp.eq.s32.totalorder %v2469_v2, %v1893_v12  ;;  %vm591_vm12 = vcmp.eq.s32.totalorder %v2472_v3, %v1904_v18  ;;  %v1984_v30 = vld [vmem:[#allocation2 + $0x6] ss:$0 sm:$0xff]  ;;  %v1993_v31 = vld [vmem:[#allocation5 + $0x6] ss:$0 sm:$0xff]  ;;  %v2004_v32 = vld [vmem:[#allocation2 + $0x7] ss:$0 sm:$0xff] }
  0x3b   :  { %2139 = vmatpush3.msk.msra.mxu1 %vm226_vm0, %v2427_v10  ;;  %2129 = vmatpush3.msk.msra.mxu0 %vm81_vm1, %v2427_v10  ;;  %vm687_vm13 = vcmp.eq.s32.totalorder %v2469_v2, %v1913_v19  ;;  %vm686_vm14 = vcmp.eq.s32.totalorder %v2472_v3, %v1913_v19  ;;  %vm685_vm0 = vcmp.eq.s32.totalorder %v2466_v1, %v1913_v19  ;;  %v2013_v33 = vld [vmem:[#allocation5 + $0x7] ss:$0 sm:$0xff]  ;;  %s1853_s3 = sshll.u32 %s2428_s2, 4  ;;  %s1854_s3 = int_to_ptr.vmem [resolvable:$true] %s1853_s3 }
  0x3c   :  { %2140 = vmatprep.subr.msk.mxu1 %vm225_vm2, %v2427_v10  ;;  %2130 = vmatprep.subr.msk.mxu0 %vm80_vm3, %v2427_v10  ;;  %vm799_vm1 = vcmp.eq.s32.totalorder %v2472_v3, %v1924_v24  ;;  %s2393_s9 = scalar_lea.vmem %s1854_s3, 128  ;;  %p2398_p7 = scmp.lt.s32.totalorder %s1854_s3, %s1854_s3 }
  0x3d   :  { %2141 = vmatpush3.msk.msra.mxu1 %vm225_vm2, %v2427_v10  ;;  %2131 = vmatpush3.msk.msra.mxu0 %vm80_vm3, %v2427_v10  ;;  %vm895_vm2 = vcmp.eq.s32.totalorder %v2469_v2, %v1933_v25  ;;  %vm894_vm3 = vcmp.eq.s32.totalorder %v2472_v3, %v1933_v25  ;;  %p2394_p6 = scmp.ne.s32.totalorder %s1854_s3, %s2393_s9  ;;  %p2399_p8 = scmp.lt.s32.totalorder %s2393_s9, %s2393_s9 }
  0x3e   :  { %2142 = vmatprep.subr.msk.mxu1 %vm224_vm4, %v2427_v10  ;;  %235 = vxpose.xlu1.b32.end [3/3] (short) (narrow) %v218_v13, 32 }
  0x3f   :  { %2143 = vmatpush3.msk.msra.mxu1 %vm224_vm4, %v2427_v10  ;;  %2150 = vmatprep.subr.msk.mxu0 %vm383_vm6, %v2427_v10  ;;  %vm798_vm4 = vcmp.eq.s32.totalorder %v2466_v1, %v1924_v24  ;;  %p2400_p9 = por %p2399_p8, %p2398_p7 }
  0x40   :  { %2160 = vmatprep.subr.msk.mxu1 %vm479_vm7, %v2427_v10 }
  0x41   :  { %p2401_p10 = pnand %p2400_p9, %p2394_p6 }
  0xb0   :  { %v2504_v15 = vpop.trf.xlu0 }
  0xb1   :  { %2132 = vmatprep.mubr.msk.f32.mxu0 %vm118_vm8, %v2504_v15 }
  0xb2   :  { %v2502_v14 = vpop.trf.xlu1 }
  0xb3   :  { %2144 = vmatprep.mubr.msk.f32.mxu1 %vm265_vm9, %v2502_v14 }
  0xb4   :  { %v2512_v17 = vpop.trf.xlu0 }
  0xb5   :  { %2133 = vmatmul.mubr.msk.f32.vlgmr.msra.gmra.mxu0 %vm118_vm8, %v2512_v17 }
  0xb6   :  { %v2510_v16 = vpop.trf.xlu1  ;;  %2151 = vmatpush3.msk.msra.mxu0 %vm383_vm6, %v2427_v10  ;;  %vm1007_vm6 = vcmp.eq.s32.totalorder %v2472_v3, %v1944_v26 }
  0xb7   :  { %2145 = vmatmul.mubr.msk.f32.vlgmr.msra.gmra.mxu1 %vm265_vm9, %v2510_v16  ;;  %2152 = vmatprep.subr.msk.mxu0 %vm382_vm10, %v2427_v10 }
  0xb8   :  { %2161 = vmatpush3.msk.msra.mxu1 %vm479_vm7, %v2427_v10  ;;  %v2533_v21 = vpop.trf.xlu0  ;;  %2153 = vmatpush3.msk.msra.mxu0 %vm382_vm10, %v2427_v10  ;;  %vm1103_vm7 = vcmp.eq.s32.totalorder %v2469_v2, %v1953_v27  ;;  %vm1102_vm10 = vcmp.eq.s32.totalorder %v2472_v3, %v1953_v27 }
  0xb9   :  { %2162 = vmatprep.subr.msk.mxu1 %vm478_vm5, %v2427_v10  ;;  %2135 = vmatprep.mubr.msk.f32.mxu0 %vm118_vm8, %v2533_v21 }
  0xba   :  { %v2531_v20 = vpop.trf.xlu1  ;;  %2163 = vmatpush3.msk.msra.mxu1 %vm478_vm5, %v2427_v10  ;;  %2172 = vmatprep.subr.msk.mxu0 %vm591_vm12, %v2427_v10  ;;  %vm893_vm5 = vcmp.eq.s32.totalorder %v2466_v1, %v1933_v25 }
  0xbb   :  { %2147 = vmatprep.mubr.msk.f32.mxu1 %vm265_vm9, %v2531_v20  ;;  %2164 = vmatprep.subr.msk.mxu1 %vm477_vm11, %v2427_v10 }
  0xbc   :  { %2165 = vmatpush3.msk.msra.mxu1 %vm477_vm11, %v2427_v10  ;;  %v2551_v23 = vpop.trf.xlu0  ;;  %vm1006_vm11 = vcmp.eq.s32.totalorder %v2466_v1, %v1944_v26 }
  0xbd   :  { %2182 = vmatprep.subr.msk.mxu1 %vm687_vm13, %v2427_v10  ;;  %2136 = vmatmul.mubr.msk.f32.gmra.mxu0 %vm118_vm8, %v2551_v23 }
  0xbe   :  { %v2549_v22 = vpop.trf.xlu1  ;;  %2154 = vmatprep.mubr.msk.f32.mxu0 %vm118_vm8, %v2504_v15 }
  0xbf   :  { %2148 = vmatmul.mubr.msk.f32.gmra.mxu1 %vm265_vm9, %v2549_v22 }
  0xc0   :  { %2166 = vmatprep.mubr.msk.f32.mxu1 %vm265_vm9, %v2502_v14 }
  0xc1   :  { %2155 = vmatmul.mubr.msk.f32.vlgmr.msra.gmra.mxu0 %vm118_vm8, %v2512_v17 }
  0xc2   :  { %2173 = vmatpush3.msk.msra.mxu0 %vm591_vm12, %v2427_v10  ;;  %2157 = vmatprep.mubr.msk.f32.mxu0 %vm118_vm8, %v2533_v21  ;;  %vm1101_vm12 = vcmp.eq.s32.totalorder %v2466_v1, %v1953_v27 }
  0xc3   :  { %2167 = vmatmul.mubr.msk.f32.vlgmr.msra.gmra.mxu1 %vm265_vm9, %v2510_v16  ;;  %2174 = vmatprep.subr.msk.mxu0 %vm590_vm15, %v2427_v10 }
  0xc4   :  { %2183 = vmatpush3.msk.msra.mxu1 %vm687_vm13, %v2427_v10  ;;  %2169 = vmatprep.mubr.msk.f32.mxu1 %vm265_vm9, %v2531_v20  ;;  %vm1215_vm13 = vcmp.eq.s32.totalorder %v2472_v3, %v1964_v28 }
  0xc5   :  { %2184 = vmatprep.subr.msk.mxu1 %vm686_vm14, %v2427_v10  ;;  %2158 = vmatmul.mubr.msk.f32.gmra.mxu0 %vm118_vm8, %v2551_v23 }
  0xc6   :  { %2185 = vmatpush3.msk.msra.mxu1 %vm686_vm14, %v2427_v10  ;;  %2175 = vmatpush3.msk.msra.mxu0 %vm590_vm15, %v2427_v10  ;;  %vm1311_vm14 = vcmp.eq.s32.totalorder %v2469_v2, %v1973_v29  ;;  %vm1310_vm15 = vcmp.eq.s32.totalorder %v2472_v3, %v1973_v29 }
  0xc7   :  { %2170 = vmatmul.mubr.msk.f32.gmra.mxu1 %vm265_vm9, %v2549_v22  ;;  %2176 = vmatprep.mubr.msk.f32.mxu0 %vm118_vm8, %v2504_v15 }
  0xc8   :  { %2186 = vmatprep.subr.msk.mxu1 %vm685_vm0, %v2427_v10  ;;  %2188 = vmatprep.mubr.msk.f32.mxu1 %vm265_vm9, %v2502_v14 }
  0xc9   :  { %2187 = vmatpush3.msk.msra.mxu1 %vm685_vm0, %v2427_v10  ;;  %2194 = vmatprep.subr.msk.mxu0 %vm799_vm1, %v2427_v10  ;;  %vm1214_vm0 = vcmp.eq.s32.totalorder %v2466_v1, %v1964_v28 }
  0xca   :  { %2204 = vmatprep.subr.msk.mxu1 %vm895_vm2, %v2427_v10  ;;  %2177 = vmatmul.mubr.msk.f32.vlgmr.msra.gmra.mxu0 %vm118_vm8, %v2512_v17 }
  0xcb   :  { %2189 = vmatmul.mubr.msk.f32.vlgmr.msra.gmra.mxu1 %vm265_vm9, %v2510_v16  ;;  %2195 = vmatpush3.msk.msra.mxu0 %vm799_vm1, %v2427_v10  ;;  %vm1309_vm1 = vcmp.eq.s32.totalorder %v2466_v1, %v1973_v29 }
  0xcc   :  { %2205 = vmatpush3.msk.msra.mxu1 %vm895_vm2, %v2427_v10  ;;  %2179 = vmatprep.mubr.msk.f32.mxu0 %vm118_vm8, %v2533_v21  ;;  %vm1423_vm2 = vcmp.eq.s32.totalorder %v2472_v3, %v1984_v30 }
  0xcd   :  { %2191 = vmatprep.mubr.msk.f32.mxu1 %vm265_vm9, %v2531_v20  ;;  %2206 = vmatprep.subr.msk.mxu1 %vm894_vm3, %v2427_v10 }
  0xce   :  { %2196 = vmatprep.subr.msk.mxu0 %vm798_vm4, %v2427_v10  ;;  %2207 = vmatpush3.msk.msra.mxu1 %vm894_vm3, %v2427_v10  ;;  %vm1519_vm3 = vcmp.eq.s32.totalorder %v2469_v2, %v1993_v31 }
  0xcf   :  { %2180 = vmatmul.mubr.msk.f32.gmra.mxu0 %vm118_vm8, %v2551_v23  ;;  %2192 = vmatmul.mubr.msk.f32.gmra.mxu1 %vm265_vm9, %v2549_v22 }
  0xd0   :  { %2197 = vmatpush3.msk.msra.mxu0 %vm798_vm4, %v2427_v10  ;;  %2198 = vmatprep.mubr.msk.f32.mxu0 %vm118_vm8, %v2504_v15  ;;  %vm1518_vm4 = vcmp.eq.s32.totalorder %v2472_v3, %v1993_v31 }
  0xd1   :  { %2208 = vmatprep.subr.msk.mxu1 %vm893_vm5, %v2427_v10  ;;  %2210 = vmatprep.mubr.msk.f32.mxu1 %vm265_vm9, %v2502_v14 }
  0xd2   :  { %2209 = vmatpush3.msk.msra.mxu1 %vm893_vm5, %v2427_v10  ;;  %2216 = vmatprep.subr.msk.mxu0 %vm1007_vm6, %v2427_v10  ;;  %vm1422_vm5 = vcmp.eq.s32.totalorder %v2466_v1, %v1984_v30 }
  0xd3   :  { %2226 = vmatprep.subr.msk.mxu1 %vm1103_vm7, %v2427_v10  ;;  %2199 = vmatmul.mubr.msk.f32.vlgmr.msra.gmra.mxu0 %vm118_vm8, %v2512_v17 }
  0xd4   :  { %2211 = vmatmul.mubr.msk.f32.vlgmr.msra.gmra.mxu1 %vm265_vm9, %v2510_v16  ;;  %2217 = vmatpush3.msk.msra.mxu0 %vm1007_vm6, %v2427_v10  ;;  %vm1517_vm6 = vcmp.eq.s32.totalorder %v2466_v1, %v1993_v31 }
  0xd5   :  { %2227 = vmatpush3.msk.msra.mxu1 %vm1103_vm7, %v2427_v10  ;;  %2201 = vmatprep.mubr.msk.f32.mxu0 %vm118_vm8, %v2533_v21  ;;  %vm1631_vm7 = vcmp.eq.s32.totalorder %v2472_v3, %v2004_v32 }
  0xd6   :  { %2213 = vmatprep.mubr.msk.f32.mxu1 %vm265_vm9, %v2531_v20  ;;  %2228 = vmatprep.subr.msk.mxu1 %vm1102_vm10, %v2427_v10 }
  0xd7   :  { %2218 = vmatprep.subr.msk.mxu0 %vm1006_vm11, %v2427_v10  ;;  %2229 = vmatpush3.msk.msra.mxu1 %vm1102_vm10, %v2427_v10  ;;  %vm1727_vm10 = vcmp.eq.s32.totalorder %v2469_v2, %v2013_v33 }
  0xd8   :  { %2202 = vmatmul.mubr.msk.f32.gmra.mxu0 %vm118_vm8, %v2551_v23  ;;  %2214 = vmatmul.mubr.msk.f32.gmra.mxu1 %vm265_vm9, %v2549_v22 }
  0xd9   :  { %2219 = vmatpush3.msk.msra.mxu0 %vm1006_vm11, %v2427_v10  ;;  %2220 = vmatprep.mubr.msk.f32.mxu0 %vm118_vm8, %v2504_v15  ;;  %vm1726_vm11 = vcmp.eq.s32.totalorder %v2472_v3, %v2013_v33 }
  0xda   :  { %2230 = vmatprep.subr.msk.mxu1 %vm1101_vm12, %v2427_v10  ;;  %2232 = vmatprep.mubr.msk.f32.mxu1 %vm265_vm9, %v2502_v14 }
  0xdb   :  { %2231 = vmatpush3.msk.msra.mxu1 %vm1101_vm12, %v2427_v10  ;;  %2238 = vmatprep.subr.msk.mxu0 %vm1215_vm13, %v2427_v10  ;;  %vm1630_vm12 = vcmp.eq.s32.totalorder %v2466_v1, %v2004_v32 }
  0xdc   :  { %2248 = vmatprep.subr.msk.mxu1 %vm1311_vm14, %v2427_v10  ;;  %2221 = vmatmul.mubr.msk.f32.vlgmr.msra.gmra.mxu0 %vm118_vm8, %v2512_v17 }
  0xdd   :  { %2233 = vmatmul.mubr.msk.f32.vlgmr.msra.gmra.mxu1 %vm265_vm9, %v2510_v16  ;;  %2239 = vmatpush3.msk.msra.mxu0 %vm1215_vm13, %v2427_v10  ;;  %vm1725_vm13 = vcmp.eq.s32.totalorder %v2466_v1, %v2013_v33 }
  0xde   :  { %2249 = vmatpush3.msk.msra.mxu1 %vm1311_vm14, %v2427_v10  ;;  %2223 = vmatprep.mubr.msk.f32.mxu0 %vm118_vm8, %v2533_v21  ;;  %vm1836_vm14 = vcmask 1042432  }
  0xdf   :  { %2235 = vmatprep.mubr.msk.f32.mxu1 %vm265_vm9, %v2531_v20  ;;  %2250 = vmatprep.subr.msk.mxu1 %vm1310_vm15, %v2427_v10 }
  0xe0   :  { %2240 = vmatprep.subr.msk.mxu0 %vm1214_vm0, %v2427_v10  ;;  %2251 = vmatpush3.msk.msra.mxu1 %vm1310_vm15, %v2427_v10  ;;  %vm1838_vm15 = vcmask 1043456  }
  0xe1   :  { %2224 = vmatmul.mubr.msk.f32.gmra.mxu0 %vm118_vm8, %v2551_v23  ;;  %2236 = vmatmul.mubr.msk.f32.gmra.mxu1 %vm265_vm9, %v2549_v22 }
  0xe2   :  { %2241 = vmatpush3.msk.msra.mxu0 %vm1214_vm0, %v2427_v10  ;;  %2242 = vmatprep.mubr.msk.f32.mxu0 %vm118_vm8, %v2504_v15  ;;  %vm1840_vm0 = vcmask 1044480  }
  0xe3   :  { %2252 = vmatprep.subr.msk.mxu1 %vm1309_vm1, %v2427_v10  ;;  %2254 = vmatprep.mubr.msk.f32.mxu1 %vm265_vm9, %v2502_v14 }
  0xe4   :  { %2253 = vmatpush3.msk.msra.mxu1 %vm1309_vm1, %v2427_v10  ;;  %2260 = vmatprep.subr.msk.mxu0 %vm1423_vm2, %v2427_v10  ;;  %vm1842_vm1 = vcmask 1045504  }
  0xe5   :  { %2270 = vmatprep.subr.msk.mxu1 %vm1519_vm3, %v2427_v10  ;;  %2243 = vmatmul.mubr.msk.f32.vlgmr.msra.gmra.mxu0 %vm118_vm8, %v2512_v17 }
  0xe6   :  { %2255 = vmatmul.mubr.msk.f32.vlgmr.msra.gmra.mxu1 %vm265_vm9, %v2510_v16  ;;  %2261 = vmatpush3.msk.msra.mxu0 %vm1423_vm2, %v2427_v10  ;;  %vm1844_vm2 = vcmask 1046528  }
  0xe7   :  { %2271 = vmatpush3.msk.msra.mxu1 %vm1519_vm3, %v2427_v10  ;;  %2245 = vmatprep.mubr.msk.f32.mxu0 %vm118_vm8, %v2533_v21 }
  0xe8   :  { %2257 = vmatprep.mubr.msk.f32.mxu1 %vm265_vm9, %v2531_v20  ;;  %2272 = vmatprep.subr.msk.mxu1 %vm1518_vm4, %v2427_v10 }
  0xe9   :  { %2262 = vmatprep.subr.msk.mxu0 %vm1422_vm5, %v2427_v10  ;;  %2273 = vmatpush3.msk.msra.mxu1 %vm1518_vm4, %v2427_v10 }
  0xea   :  { %2246 = vmatmul.mubr.msk.f32.gmra.mxu0 %vm118_vm8, %v2551_v23  ;;  %2258 = vmatmul.mubr.msk.f32.gmra.mxu1 %vm265_vm9, %v2549_v22 }
  0xeb   :  { %2263 = vmatpush3.msk.msra.mxu0 %vm1422_vm5, %v2427_v10  ;;  %2264 = vmatprep.mubr.msk.f32.mxu0 %vm118_vm8, %v2504_v15 }
  0xec   :  { %2274 = vmatprep.subr.msk.mxu1 %vm1517_vm6, %v2427_v10  ;;  %2276 = vmatprep.mubr.msk.f32.mxu1 %vm265_vm9, %v2502_v14 }
  0xed   :  { %2275 = vmatpush3.msk.msra.mxu1 %vm1517_vm6, %v2427_v10  ;;  %2282 = vmatprep.subr.msk.mxu0 %vm1631_vm7, %v2427_v10 }
  0xee   :  { %2292 = vmatprep.subr.msk.mxu1 %vm1727_vm10, %v2427_v10  ;;  %2265 = vmatmul.mubr.msk.f32.vlgmr.msra.gmra.mxu0 %vm118_vm8, %v2512_v17 }
  0xef   :  { %2277 = vmatmul.mubr.msk.f32.vlgmr.msra.gmra.mxu1 %vm265_vm9, %v2510_v16  ;;  %2283 = vmatpush3.msk.msra.mxu0 %vm1631_vm7, %v2427_v10 }
  0xf0   :  { %2293 = vmatpush3.msk.msra.mxu1 %vm1727_vm10, %v2427_v10  ;;  %2267 = vmatprep.mubr.msk.f32.mxu0 %vm118_vm8, %v2533_v21 }
  0xf1   :  { %2279 = vmatprep.mubr.msk.f32.mxu1 %vm265_vm9, %v2531_v20  ;;  %2294 = vmatprep.subr.msk.mxu1 %vm1726_vm11, %v2427_v10 }
  0xf2   :  { %2284 = vmatprep.subr.msk.mxu0 %vm1630_vm12, %v2427_v10  ;;  %2295 = vmatpush3.msk.msra.mxu1 %vm1726_vm11, %v2427_v10 }
  0xf3   :  { %2268 = vmatmul.mubr.msk.f32.gmra.mxu0 %vm118_vm8, %v2551_v23  ;;  %2280 = vmatmul.mubr.msk.f32.gmra.mxu1 %vm265_vm9, %v2549_v22 }
  0xf4   :  { %2285 = vmatpush3.msk.msra.mxu0 %vm1630_vm12, %v2427_v10  ;;  %2286 = vmatprep.mubr.msk.f32.mxu0 %vm118_vm8, %v2504_v15 }
  0xf5   :  { %2296 = vmatprep.subr.msk.mxu1 %vm1725_vm13, %v2427_v10  ;;  %2298 = vmatprep.mubr.msk.f32.mxu1 %vm265_vm9, %v2502_v14 }
  0xf6   :  { %2297 = vmatpush3.msk.msra.mxu1 %vm1725_vm13, %v2427_v10 }
  0xf7   :  { %2287 = vmatmul.mubr.msk.f32.vlgmr.msra.gmra.mxu0 %vm118_vm8, %v2512_v17  ;;  %2299 = vmatmul.mubr.msk.f32.vlgmr.msra.gmra.mxu1 %vm265_vm9, %v2510_v16 }
  0xf8   :  { %2289 = vmatprep.mubr.msk.f32.mxu0 %vm118_vm8, %v2533_v21  ;;  %2301 = vmatprep.mubr.msk.f32.mxu1 %vm265_vm9, %v2531_v20 }
  0xfb   :  { %2290 = vmatmul.mubr.msk.f32.gmra.mxu0 %vm118_vm8, %v2551_v23  ;;  %2302 = vmatmul.mubr.msk.f32.gmra.mxu1 %vm265_vm9, %v2549_v22  ;;  %vm1832_vm8 = vcmask 1040384   ;;  %vm1834_vm9 = vcmask 1041408  }
 0x175   :  { %v2134_v34 = vpop.f32.mrf.mxu0 }
 0x177   :  { %v2146_v35 = vpop.f32.mrf.mxu1  ;;  %v197_v36 = vpop.f32.mrf.mxu0 }
 0x178   :  { %v364_v17 = vmul.f32 %v2146_v35, %v2134_v34 }
 0x179   :  { %v344_v37 = vpop.f32.mrf.mxu1 }
 0x17a   :  { %v363_v11 = vmul.f32 %v344_v37, %v197_v36 }
 0x17c   :  { %v367_v26 = vadd.f32 %v364_v17, %v363_v11 }
 0x17d   :  { %v2762_v38 = vpop.f32.mrf.mxu0 }
 0x17f   :  { %v2764_v39 = vpop.f32.mrf.mxu1  ;;  %v207_v40 = vpop.f32.mrf.mxu0 }
 0x181   :  { %v354_v41 = vpop.f32.mrf.mxu1  ;;  %v2156_v42 = vpop.f32.mrf.mxu0 }
 0x182   :  { %v365_v20 = vmul.f32 %v354_v41, %v207_v40 }
 0x183   :  { %v2168_v43 = vpop.f32.mrf.mxu1  ;;  %v454_v44 = vpop.f32.mrf.mxu0 }
 0x184   :  { %v572_v12 = vmul.f32 %v2168_v43, %v2156_v42  ;;  %v368_v35 = vadd.f32 %v367_v26, %v365_v20 }
 0x185   :  { %v552_v45 = vpop.f32.mrf.mxu1  ;;  %v2159_v46 = vpop.f32.mrf.mxu0 }
 0x186   :  { %v571_v8 = vmul.f32 %v552_v45, %v454_v44  ;;  %v366_v45 = vmul.f32 %v2764_v39, %v2762_v38 }
 0x187   :  { %v2171_v47 = vpop.f32.mrf.mxu1  ;;  %v464_v48 = vpop.f32.mrf.mxu0 }
 0x188   :  { %v575_v18 = vadd.f32 %v572_v12, %v571_v8  ;;  %v574_v37 = vmul.f32 %v2171_v47, %v2159_v46  ;;  %v369_v47 = vadd.f32 %v368_v35, %v366_v45 }
 0x189   :  { %v562_v49 = vpop.f32.mrf.mxu1 }
 0x18a   :  { %v2178_v50 = vpop.f32.mrf.mxu0  ;;  %v573_v13 = vmul.f32 %v562_v49, %v464_v48 }
 0x18b   :  { %v2190_v51 = vpop.f32.mrf.mxu1 }
 0x18c   :  { %v662_v52 = vpop.f32.mrf.mxu0  ;;  %v780_v21 = vmul.f32 %v2190_v51, %v2178_v50  ;;  %v576_v27 = vadd.f32 %v575_v18, %v573_v13 }
 0x18d   :  { %v760_v53 = vpop.f32.mrf.mxu1 }
 0x18e   :  { %v779_v14 = vmul.f32 %v760_v53, %v662_v52  ;;  %v577_v48 = vadd.f32 %v576_v27, %v574_v37 }
 0x18f   :  { %v2181_v54 = vpop.f32.mrf.mxu0  ;;  %v2193_v55 = vpop.f32.mrf.mxu1 }
 0x190   :  { %v783_v30 = vadd.f32 %v780_v21, %v779_v14  ;;  %v782_v51 = vmul.f32 %v2193_v55, %v2181_v54  ;;  %v370_v54 = vrot.slane %v369_v47, 4 }
 0x191   :  { %v672_v56 = vpop.f32.mrf.mxu0  ;;  %v770_v57 = vpop.f32.mrf.mxu1 }
 0x192   :  { %v781_v22 = vmul.f32 %v770_v57, %v672_v56 }
 0x193   :  { %v2200_v58 = vpop.f32.mrf.mxu0 }
 0x194   :  { %v2212_v59 = vpop.f32.mrf.mxu1  ;;  %v784_v43 = vadd.f32 %v783_v30, %v781_v22 }
 0x195   :  { %v870_v60 = vpop.f32.mrf.mxu0  ;;  %v988_v28 = vmul.f32 %v2212_v59, %v2200_v58 }
 0x196   :  { %v968_v61 = vpop.f32.mrf.mxu1  ;;  %v785_v59 = vadd.f32 %v784_v43, %v782_v51 }
 0x197   :  { %v987_v19 = vmul.f32 %v968_v61, %v870_v60 }
 0x198   :  { %v2203_v62 = vpop.f32.mrf.mxu0  ;;  %v2215_v63 = vpop.f32.mrf.mxu1  ;;  %v786_v55 = vrot.slane %v785_v59, 4 }
 0x199   :  { %v991_v42 = vadd.f32 %v988_v28, %v987_v19  ;;  %v990_v57 = vmul.f32 %v2215_v63, %v2203_v62 }
 0x19a   :  { %v880_v0 = vpop.f32.mrf.mxu0  ;;  %v978_v1 = vpop.f32.mrf.mxu1  ;;  %v787_v17 = vadd.f32 %v786_v55, %v785_v59 }
 0x19b   :  { %v989_v29 = vmul.f32 %v978_v1, %v880_v0 }
 0x19c   :  { %v2222_v2 = vpop.f32.mrf.mxu0 }
 0x19d   :  { %v2234_v3 = vpop.f32.mrf.mxu1  ;;  %v992_v49 = vadd.f32 %v991_v42, %v989_v29 }
 0x19e   :  { %v1078_v4 = vpop.f32.mrf.mxu0  ;;  %v1196_v31 = vmul.f32 %v2234_v3, %v2222_v2 }
 0x19f   :  { %v1176_v5 = vpop.f32.mrf.mxu1  ;;  %v993_v0 = vadd.f32 %v992_v49, %v990_v57 }
 0x1a0   :  { %v1195_v23 = vmul.f32 %v1176_v5, %v1078_v4  ;;  %v578_v4 = vrot.slane %v577_v48, 4 }
 0x1a1   :  { %v2225_v6 = vpop.f32.mrf.mxu0  ;;  %v2237_v7 = vpop.f32.mrf.mxu1 }
 0x1a2   :  { %v1199_v40 = vadd.f32 %v1196_v31, %v1195_v23  ;;  %v1198_v60 = vmul.f32 %v2237_v7, %v2225_v6  ;;  %v579_v11 = vadd.f32 %v578_v4, %v577_v48  ;;  %v788_v31 = vrot.slane %v787_v17, 2 }
 0x1a3   :  { %v1088_v9 = vpop.f32.mrf.mxu0  ;;  %v1186_v10 = vpop.f32.mrf.mxu1 }
 0x1a4   :  { %v1197_v32 = vmul.f32 %v1186_v10, %v1088_v9  ;;  %v994_v10 = vrot.slane %v993_v0, 4  ;;  %v580_v23 = vrot.slane %v579_v11, 2  ;;  %v789_v49 = vadd.f32 %v788_v31, %v787_v17 }
 0x1a5   :  { %v2244_v15 = vpop.f32.mrf.mxu0 }
 0x1a6   :  { %v2256_v16 = vpop.f32.mrf.mxu1  ;;  %v1200_v52 = vadd.f32 %v1199_v40, %v1197_v32  ;;  %v995_v19 = vadd.f32 %v994_v10, %v993_v0 }
 0x1a7   :  { %v1286_v24 = vpop.f32.mrf.mxu0  ;;  %v1404_v41 = vmul.f32 %v2256_v16, %v2244_v15  ;;  %v371_v16 = vadd.f32 %v370_v54, %v369_v47  ;;  %v790_v47 = vrot.slane %v789_v49, 1 }
 0x1a8   :  { %v1384_v25 = vpop.f32.mrf.mxu1  ;;  %v1201_v38 = vadd.f32 %v1200_v52, %v1198_v60 }
 0x1a9   :  { %v1403_v33 = vmul.f32 %v1384_v25, %v1286_v24  ;;  %v372_v30 = vrot.slane %v371_v16, 2 }
 0x1aa   :  { %v2247_v36 = vpop.f32.mrf.mxu0  ;;  %v2259_v34 = vpop.f32.mrf.mxu1  ;;  %v1202_v12 = vrot.slane %v1201_v38, 4 }
 0x1ab   :  { %v1407_v53 = vadd.f32 %v1404_v41, %v1403_v33  ;;  %v1406_v1 = vmul.f32 %v2259_v34, %v2247_v36  ;;  %v996_v33 = vrot.slane %v995_v19, 2  ;;  %v581_v34 = vadd.f32 %v580_v23, %v579_v11 }
 0x1ac   :  { %v1296_v44 = vpop.f32.mrf.mxu0  ;;  %v1394_v50 = vpop.f32.mrf.mxu1  ;;  %v1203_v24 = vadd.f32 %v1202_v12, %v1201_v38  ;;  %v373_v48 = vadd.f32 %v372_v30, %v371_v16  ;;  %v791_v38 = vadd.f32 %v790_v47, %v789_v49 }
 0x1ad   :  { %v1405_v56 = vmul.f32 %v1394_v50, %v1296_v44  ;;  %v997_v50 = vadd.f32 %v996_v33, %v995_v19  ;;  %v582_v57 = vrot.slane %v581_v34, 1 }
 0x1ae   :  { %v2266_v58 = vpop.f32.mrf.mxu0  ;;  %v1204_v35 = vrot.slane %v1203_v24, 2  ;;  %v374_v60 = vrot.slane %v373_v48, 1 }
 0x1af   :  { %v2278_v46 = vpop.f32.mrf.mxu1  ;;  %v1408_v61 = vadd.f32 %v1407_v53, %v1405_v56 }
 0x1b0   :  { %v1494_v2 = vpop.f32.mrf.mxu0  ;;  %v1612_v62 = vmul.f32 %v2278_v46, %v2266_v58  ;;  %v1205_v56 = vadd.f32 %v1204_v35, %v1203_v24 }
 0x1b1   :  { %v1592_v3 = vpop.f32.mrf.mxu1  ;;  %v1409_v39 = vadd.f32 %v1408_v61, %v1406_v1  ;;  %v998_v61 = vrot.slane %v997_v50, 1 }
 0x1b2   :  { %v1611_v5 = vmul.f32 %v1592_v3, %v1494_v2  ;;  %v1206_v1 = vrot.slane %v1205_v56, 1  ;;  %v583_v2 = vadd.f32 %v582_v57, %v581_v34 }
 0x1b3   :  { %v2269_v8 = vpop.f32.mrf.mxu0  ;;  %v2281_v9 = vpop.f32.mrf.mxu1  ;;  %v1410_v6 = vrot.slane %v1409_v39, 4 }
 0x1b4   :  { %v1615_v7 = vadd.f32 %v1612_v62, %v1611_v5  ;;  %v1614_v20 = vmul.f32 %v2281_v9, %v2269_v8  ;;  %v375_v5 = vadd.f32 %v374_v60, %v373_v48  ;;  %v999_v8 = vadd.f32 %v998_v61, %v997_v50 }
 0x1b5   :  { %v1504_v63 = vpop.f32.mrf.mxu0  ;;  %v1602_v13 = vpop.f32.mrf.mxu1  ;;  %v1411_v26 = vadd.f32 %v1410_v6, %v1409_v39  ;;  %v1207_v55 = vadd.f32 %v1206_v1, %v1205_v56 }
 0x1b6   :  { %v1613_v14 = vmul.f32 %v1602_v13, %v1504_v63  ;;  %v1833_v9 = vsel %vm1832_vm8, %v375_v5, %v583_v2 }
 0x1b7   :  { %v2288_v15 = vpop.f32.mrf.mxu0  ;;  %v2300_v18 = vpop.f32.mrf.mxu1  ;;  %v1412_v40 = vrot.slane %v1411_v26, 2  ;;  %v1835_v11 = vsel %vm1834_vm9, %v1833_v9, %v791_v38 }
 0x1b8   :  { %v1616_v21 = vadd.f32 %v1615_v7, %v1613_v14  ;;  %v1820_v37 = vmul.f32 %v2300_v18, %v2288_v15  ;;  %v1837_v13 = vsel %vm1836_vm14, %v1835_v11, %v999_v8 }
 0x1b9   :  { %v1702_v22 = vpop.f32.mrf.mxu0  ;;  %v1800_v25 = vpop.f32.mrf.mxu1  ;;  %v1413_v58 = vadd.f32 %v1412_v40, %v1411_v26  ;;  %v1839_v6 = vsel %vm1838_vm15, %v1837_v13, %v1207_v55 }
 0x1ba   :  { %v1617_v27 = vadd.f32 %v1616_v21, %v1614_v20  ;;  %v1819_v28 = vmul.f32 %v1800_v25, %v1702_v22 }
 0x1bb   :  { %v2291_v29 = vpop.f32.mrf.mxu0  ;;  %v2303_v32 = vpop.f32.mrf.mxu1  ;;  %v1414_v3 = vrot.slane %v1413_v58, 1 }
 0x1bc   :  { %v1618_v36 = vrot.slane %v1617_v27, 4  ;;  %v1823_v44 = vadd.f32 %v1820_v37, %v1819_v28  ;;  %v1822_v52 = vmul.f32 %v2303_v32, %v2291_v29 }
 0x1bd   :  { %v1712_v42 = vpop.f32.mrf.mxu0  ;;  %v1810_v43 = vpop.f32.mrf.mxu1  ;;  %v1415_v10 = vadd.f32 %v1414_v3, %v1413_v58 }
 0x1be   :  { %v1619_v41 = vadd.f32 %v1618_v36, %v1617_v27  ;;  %v1821_v45 = vmul.f32 %v1810_v43, %v1712_v42 }
 0x1bf   :  { %v1841_v14 = vsel %vm1840_vm0, %v1839_v6, %v1415_v10 }
 0x1c0   :  { %v1620_v51 = vrot.slane %v1619_v41, 2  ;;  %v1824_v53 = vadd.f32 %v1823_v44, %v1821_v45 }
 0x1c2   :  { %v1825_v46 = vadd.f32 %v1824_v53, %v1822_v52  ;;  %v1621_v59 = vadd.f32 %v1620_v51, %v1619_v41 }
 0x1c4   :  { %v1826_v0 = vrot.slane %v1825_v46, 4  ;;  %v1622_v39 = vrot.slane %v1621_v59, 1 }
 0x1c6   :  { %v1827_v4 = vadd.f32 %v1826_v0, %v1825_v46  ;;  %v1623_v63 = vadd.f32 %v1622_v39, %v1621_v59 }
 0x1c8   :  { %v1828_v54 = vrot.slane %v1827_v4, 2  ;;  %v1843_v15 = vsel %vm1842_vm1, %v1841_v14, %v1623_v63 }
 0x1ca   :  { %v1829_v62 = vadd.f32 %v1828_v54, %v1827_v4 }
 0x1cc   :  { %v1830_v12 = vrot.slane %v1829_v62, 1 }
 0x1ce   :  { %v1831_v7 = vadd.f32 %v1830_v12, %v1829_v62 }
 0x1d0   :  { %v1845_v16 = vsel %vm1844_vm2, %v1843_v15, %v1831_v7 }
 0x1d1   :  { %1846 = vst [vmem:[#allocation10] sm:$0xff] %v1845_v16 }
 0x1d2   :  { %2404 = shalt.err (!%p2401_p10)
}
 0x1d3   :  { %1856 = dma.vmem_to_hbm [thread:$0]  %s1854_s3, 128, %s2775_s4, [#allocation4]  }
 0x1d4   :  { %2419 = dma.done.wait [#allocation4], 128  }
 0x1d5   :  { %2420 = vsyncadd [#allocation4], 4294967168 }
 0x1d6   :  { %1860 = vsyncpa [#allocation3], 1 }
 0x1d7   :  { %1861 = vsyncpa [#allocation6], 1 }
 0x1d8   :  { %1862 = vsyncpa [#allocation9], 1 }
 0x1d9   :  { %1863 = vsyncpa [#allocation4], 1 }

</bundles_post_ra>
